<compile_context>
chip_gen: v7x
topology: tpu7x:2x2x1
jax: 0.10.0
libtpu: 0.0.40
codegen_flags: <defaults>
</compile_context>

<pallas_src>
import functools
import math

import jax
import jax.numpy as jnp
from jax.experimental import pallas as pl
from jax.experimental.pallas import tpu as pltpu


# ---------------------------------------------------------------------------
# Parameter setup (plain JAX): sinusoidal PE table, matches the torch buffer.
# ---------------------------------------------------------------------------
def make_pe_table(d_model: int, max_len: int = 5000) -> jnp.ndarray:
    """[max_len, 1, d_model] float32 sinusoidal positional-encoding table."""
    position = jnp.arange(max_len, dtype=jnp.float32)[:, None]                # [max_len, 1]
    div_term = jnp.exp(
        jnp.arange(0, d_model, 2, dtype=jnp.float32) * (-math.log(10000.0) / d_model)
    )                                                                          # [d_model//2]
    pe = jnp.zeros((max_len, d_model), dtype=jnp.float32)
    pe = pe.at[:, 0::2].set(jnp.sin(position * div_term))
    pe = pe.at[:, 1::2].set(jnp.cos(position * div_term))
    return pe[:, None, :]                                                      # [max_len, 1, d_model]


# ---------------------------------------------------------------------------
# Stateless integer-hash "keep" mask (shared by both dropout kernels).
# ---------------------------------------------------------------------------
def _hash_keep_mask(lin_idx, seed_scalar, p: float):
    """lin_idx: int32 array of per-element stream indices -> bool keep mask."""
    h = lin_idx ^ (seed_scalar * jnp.int32(0x27D4EB2D))        # mix in the seed
    h = ((h >> 16) ^ h) * jnp.int32(0x45D9F3B)                 # int32 finalizer (wraps)
    h = ((h >> 16) ^ h) * jnp.int32(0x45D9F3B)
    h = (h >> 16) ^ h
    bits = h & jnp.int32(0x7FFFFFFF)                           # ~uniform in [0, 2^31)
    thr = min(int(p * (1 << 31)), (1 << 31) - 1)               # static threshold
    return bits >= jnp.int32(thr)                              # P(keep) ~= 1 - p


# ---------------------------------------------------------------------------
# Kernels
# ---------------------------------------------------------------------------
def _pe_add_kernel(x_ref, pe_ref, o_ref):
    # eval mode: dropout is identity; pe broadcasts over the batch axis.
    o_ref[...] = x_ref[...] + pe_ref[...]


def _pe_add_dropout_kernel(seed_ref, x_ref, pe_ref, o_ref, *, p: float, tile_s: int):
    # training mode: add PE, then inverted dropout (per-element mask).
    y = x_ref[...] + pe_ref[...]
    ts, b, d = y.shape  # static block shape

    # Global element index (unique across tiles) -> independent mask per element.
    r = jax.lax.broadcasted_iota(jnp.int32, (ts, b, d), 0)
    bi = jax.lax.broadcasted_iota(jnp.int32, (ts, b, d), 1)
    di = jax.lax.broadcasted_iota(jnp.int32, (ts, b, d), 2)
    row = r + pl.program_id(0) * tile_s                        # tile id mixed into stream
    lin = (row * b + bi) * d + di

    keep = _hash_keep_mask(lin, seed_ref[0], p)
    scale = jnp.float32(1.0 / (1.0 - p))
    o_ref[...] = jnp.where(keep, y * scale, jnp.zeros_like(y)).astype(o_ref.dtype)


def _locked_dropout_kernel(seed_ref, x_ref, o_ref, *, p: float):
    # LockedDropout: mask depends only on (batch, feature) -> shared over seq.
    y = x_ref[...]
    ts, b, d = y.shape
    bi = jax.lax.broadcasted_iota(jnp.int32, (ts, b, d), 1)
    di = jax.lax.broadcasted_iota(jnp.int32, (ts, b, d), 2)
    lin = bi * d + di                                          # NO seq / tile dependence

    keep = _hash_keep_mask(lin, seed_ref[0], p)
    scale = jnp.float32(1.0 / (1.0 - p))
    o_ref[...] = jnp.where(keep, y * scale, jnp.zeros_like(y)).astype(o_ref.dtype)


# ---------------------------------------------------------------------------
# Tiling / compiler-param helpers
# ---------------------------------------------------------------------------
def _round_up(v: int, m: int) -> int:
    return (v + m - 1) // m * m


def _choose_tile_s(S: int, B: int, D: int, dtype_bytes: int = 4,
                   vmem_budget: int = 16 << 20) -> int:
    """Seq-tile size so double-buffered x/pe/out blocks fit VMEM, accounting for
    the (8, 128) layout padding of the small trailing (B, D) dims."""
    pb = _round_up(max(B, 1), 8)           # second-minor dim padded to sublanes
    pd = _round_up(max(D, 1), 128)         # minor dim padded to lanes
    # 2x pipeline buffers * (x block + out block + pe block) per seq row.
    bytes_per_row = 2 * (2 * pb * pd + 8 * pd) * dtype_bytes
    ts = max(8, vmem_budget // max(bytes_per_row, 1))
    ts = min(ts, S, 2048)
    if ts >= 8:
        ts = (ts // 8) * 8                 # sublane-friendly seq tiles
    return int(max(1, min(ts, S)))


def _compiler_params():
    return pltpu.CompilerParams(
        dimension_semantics=("parallel",),  # v7x: shard seq tiles over 2 TCs
        vmem_limit_bytes=32 << 20,          # safe on v5e/v6e/v7x; tiles sized under it
    )


# ---------------------------------------------------------------------------
# Wrappers
# ---------------------------------------------------------------------------
def positional_encoding(x, pe, *, dropout_p: float = 0.1, training: bool = False,
                        seed: int = 0):
    """PositionalEncoding.forward.  x: [S, B, D], pe: [max_len, 1, D] -> [S, B, D]."""
    S, B, D = x.shape
    ts = _choose_tile_s(S, B, D)
    grid = (pl.cdiv(S, ts),)

    if (not training) or dropout_p <= 0.0:
        return pl.pallas_call(
            _pe_add_kernel,
            out_shape=jax.ShapeDtypeStruct((S, B, D), x.dtype),
            grid_spec=pltpu.PrefetchScalarGridSpec(
                num_scalar_prefetch=0,
                grid=grid,
                in_specs=[
                    pl.BlockSpec((ts, B, D), lambda i: (i, 0, 0)),
                    # Full pe table passed in; BlockSpec picks the rows (no host slice).
                    pl.BlockSpec((ts, 1, D), lambda i: (i, 0, 0)),
                ],
                out_specs=pl.BlockSpec((ts, B, D), lambda i: (i, 0, 0)),
            ),
            compiler_params=_compiler_params(),
        )(x, pe)

    if dropout_p >= 1.0:
        return jnp.zeros_like(x)

    seed_arr = jnp.asarray([seed], dtype=jnp.int32)
    kernel = functools.partial(_pe_add_dropout_kernel, p=float(dropout_p), tile_s=ts)
    return pl.pallas_call(
        kernel,
        out_shape=jax.ShapeDtypeStruct((S, B, D), x.dtype),
        grid_spec=pltpu.PrefetchScalarGridSpec(
            num_scalar_prefetch=1,
            grid=grid,
            in_specs=[
                pl.BlockSpec((ts, B, D), lambda i, seed_ref: (i, 0, 0)),
                pl.BlockSpec((ts, 1, D), lambda i, seed_ref: (i, 0, 0)),
            ],
            out_specs=pl.BlockSpec((ts, B, D), lambda i, seed_ref: (i, 0, 0)),
        ),
        compiler_params=_compiler_params(),
    )(seed_arr, x, pe)


def locked_dropout(x, *, dropout: float = 0.5, training: bool = False, seed: int = 0):
    """LockedDropout.forward.  x: [S, B, D] -> [S, B, D] (mask shared over seq)."""
    if (not training) or dropout <= 0.0:
        return x
    if dropout >= 1.0:
        return jnp.zeros_like(x)

    S, B, D = x.shape
    ts = _choose_tile_s(S, B, D)
    grid = (pl.cdiv(S, ts),)
    seed_arr = jnp.asarray([seed], dtype=jnp.int32)
    kernel = functools.partial(_locked_dropout_kernel, p=float(dropout))
    return pl.pallas_call(
        kernel,
        out_shape=jax.ShapeDtypeStruct((S, B, D), x.dtype),
        grid_spec=pltpu.PrefetchScalarGridSpec(
            num_scalar_prefetch=1,
            grid=grid,
            in_specs=[pl.BlockSpec((ts, B, D), lambda i, seed_ref: (i, 0, 0))],
            out_specs=pl.BlockSpec((ts, B, D), lambda i, seed_ref: (i, 0, 0)),
        ),
        compiler_params=_compiler_params(),
    )(seed_arr, x)


# ---------------------------------------------------------------------------
# Self-test
# ---------------------------------------------------------------------------
if __name__ == "__main__":
    d_model = 32
    seq_len = 8
    batch = 2
    dropout_p = 0.1

    key = jax.random.PRNGKey(0)
    kx, kt = jax.random.split(key)
    x = jax.random.normal(kx, (seq_len, batch, d_model), dtype=jnp.float32)
    pe = make_pe_table(d_model, max_len=5000)

    # --- PositionalEncoding, eval mode (dropout = identity): exact --------------
    out_eval = jax.block_until_ready(
        positional_encoding(x, pe, dropout_p=dropout_p, training=False))
    ref = x + pe[:seq_len]                                   # broadcast over batch
    assert out_eval.shape == (seq_len, batch, d_model)
    assert jnp.allclose(out_eval, ref, atol=1e-6), "eval-mode PE mismatch"

    # --- PositionalEncoding, training mode (inverted dropout) -------------------
    # RNG stream differs from torch, but semantics match: kept == ref/(1-p), dropped == 0.
    out_train = jax.block_until_ready(
        positional_encoding(x, pe, dropout_p=dropout_p, training=True, seed=1234))
    assert out_train.shape == (seq_len, batch, d_model)
    kept = out_train != 0
    assert jnp.allclose(
        jnp.where(kept, out_train, 0.0),
        jnp.where(kept, ref / (1.0 - dropout_p), 0.0),
        atol=1e-5,
    ), "training-mode dropout scaling mismatch"

    # --- LockedDropout (decoder input dropout) -----------------------------------
    tgt = jax.random.normal(kt, (seq_len, batch, d_model), dtype=jnp.float32)
    ld = jax.block_until_ready(locked_dropout(tgt, dropout=0.5, training=True, seed=7))
    assert ld.shape == (seq_len, batch, d_model)
    keep_mask0 = ld[0] != 0
    for s in range(seq_len):                                  # mask locked across seq
        assert jnp.array_equal(ld[s] != 0, keep_mask0), "locked-dropout mask not shared over seq"
    ld_kept = ld != 0
    assert jnp.allclose(
        jnp.where(ld_kept, ld, 0.0),
        jnp.where(ld_kept, tgt / 0.5, 0.0),
        atol=1e-5,
    ), "locked-dropout scaling mismatch"
    ld_eval = jax.block_until_ready(locked_dropout(tgt, dropout=0.5, training=False))
    assert jnp.allclose(ld_eval, tgt), "eval-mode locked dropout should be identity"

    print("KERNEL_OK")
</pallas_src>

<mosaic_0001>
module attributes {stable_mosaic.version = 11 : i64} {
  func.func @_pe_add_kernel(%arg0: i32, %arg1: memref<8x2x32xf32, #tpu.memory_space<vmem>>, %arg2: memref<8x1x32xf32, #tpu.memory_space<vmem>>, %arg3: memref<8x2x32xf32, #tpu.memory_space<vmem>>) attributes {dimension_semantics = [#tpu.dimension_semantics<parallel>], iteration_bounds = array<i64: 1>, scalar_prefetch = 0 : i64, scratch_operands = 0 : i64, tpu.core_type = #tpu.core_type<tc>, window_params = [{transform_indices = @transform_0, window_bounds = array<i64: 8, 2, 32>}, {transform_indices = @transform_1, window_bounds = array<i64: 8, 1, 32>}, {transform_indices = @transform_2, window_bounds = array<i64: 8, 2, 32>}]} {
    %c0 = arith.constant 0 : index
    %c0_0 = arith.constant 0 : index
    %c0_1 = arith.constant 0 : index
    %0 = vector.load %arg1[%c0, %c0_0, %c0_1] : memref<8x2x32xf32, #tpu.memory_space<vmem>>, vector<8x2x32xf32>
    %c0_2 = arith.constant 0 : index
    %c0_3 = arith.constant 0 : index
    %c0_4 = arith.constant 0 : index
    %1 = vector.load %arg2[%c0_2, %c0_3, %c0_4] : memref<8x1x32xf32, #tpu.memory_space<vmem>>, vector<8x1x32xf32>
    %2 = vector.broadcast %1 : vector<8x1x32xf32> to vector<8x2x32xf32>
    %3 = arith.addf %0, %2 : vector<8x2x32xf32>
    %c0_5 = arith.constant 0 : index
    %c0_6 = arith.constant 0 : index
    %c0_7 = arith.constant 0 : index
    %4 = vector.load %arg3[%c0_5, %c0_6, %c0_7] : memref<8x2x32xf32, #tpu.memory_space<vmem>>, vector<8x2x32xf32>
    tpu.vector_store %arg3[%c0_5, %c0_6, %c0_7], %3 {strides = array<i32>} : memref<8x2x32xf32, #tpu.memory_space<vmem>>, vector<8x2x32xf32>,
    return
  }
  func.func @transform_0(%arg0: i32) -> (i32, i32, i32) {
    %c0_i32 = arith.constant 0 : i32
    %c0_i32_0 = arith.constant 0 : i32
    %c0_i32_1 = arith.constant 0 : i32
    return %arg0, %c0_i32, %c0_i32_0 : i32, i32, i32
  }
  func.func @transform_1(%arg0: i32) -> (i32, i32, i32) {
    %c0_i32 = arith.constant 0 : i32
    %c0_i32_0 = arith.constant 0 : i32
    %c0_i32_1 = arith.constant 0 : i32
    return %arg0, %c0_i32, %c0_i32_0 : i32, i32, i32
  }
  func.func @transform_2(%arg0: i32) -> (i32, i32, i32) {
    %c0_i32 = arith.constant 0 : i32
    %c0_i32_0 = arith.constant 0 : i32
    %c0_i32_1 = arith.constant 0 : i32
    return %arg0, %c0_i32, %c0_i32_0 : i32, i32, i32
  }
}

</mosaic_0001>

<bundles_post_ra>
// kernel: tpu_custom_call.1
= control target key start
LH: loop header
LB: loop body
LE: loop exit
PB: predicated region body
PF: predicated region fallthrough
CT: control target
= control target key end

     0   :  { %vm84_vm0 = vcmask 254976   ;;  %s230_s0 = inlined_call_operand.vmem [shape: f32[8,2,32], index: 0, kind: input, shape index: {}]   ;;  %s231_s1 = inlined_call_operand.vmem [shape: f32[5000,1,32], index: 1, kind: input, shape index: {}]   ;;  %s232_s2 = inlined_call_operand.hbm [shape: f32[8,2,32], index: 2, kind: output, shape index: {}]  }
   0x1   :  { %v12_v0 = vld [vmem:[%s230_s0] sm:$0x3]  ;;  %v13_v3 = vld [vmem:[%s230_s0 + $0x2] sm:$0x3]  ;;  %v14_v5 = vld [vmem:[%s230_s0 + $0x4] sm:$0x3] }
   0x2   :  { %v109_v1 = vld [vmem:[%s231_s1] ss:$0 sm:$0xff]  ;;  %v110_v4 = vld [vmem:[%s231_s1 + $0x1] ss:$0 sm:$0xff]  ;;  %v111_v7 = vld [vmem:[%s231_s1 + $0x2] ss:$0 sm:$0xff] }
   0x3   :  { %v76_v2 = vadd.f32 %v109_v1, %v12_v0  ;;  %v77_v6 = vadd.f32 %v110_v4, %v13_v3  ;;  %v15_v8 = vld [vmem:[%s230_s0 + $0x6] sm:$0x3]  ;;  %v112_v9 = vld [vmem:[%s231_s1 + $0x3] ss:$0 sm:$0xff]  ;;  %v78_v10 = vadd.f32 %v111_v7, %v14_v5  ;;  %v16_v12 = vld [vmem:[%s230_s0 + $0x8] sm:$0x3] }
   0x4   :  { %v79_v11 = vadd.f32 %v112_v9, %v15_v8  ;;  %v113_v13 = vld [vmem:[%s231_s1 + $0x4] ss:$0 sm:$0xff]  ;;  %v17_v14 = vld [vmem:[%s230_s0 + $0xa] sm:$0x3]  ;;  %v114_v16 = vld [vmem:[%s231_s1 + $0x5] ss:$0 sm:$0xff] }
   0x5   :  { %85 = vst.msk [vmem:[#allocation2] sm:$0x3] %vm84_vm0, %v76_v2  ;;  %86 = vst.msk [vmem:[#allocation2 + $0x2] sm:$0x3] %vm84_vm0, %v77_v6  ;;  %v80_v15 = vadd.f32 %v113_v13, %v16_v12  ;;  %v18_v17 = vld [vmem:[%s230_s0 + $0xc] sm:$0x3]  ;;  %v81_v19 = vadd.f32 %v114_v16, %v17_v14 }
   0x6   :  { %v115_v18 = vld [vmem:[%s231_s1 + $0x6] ss:$0 sm:$0xff]  ;;  %87 = vst.msk [vmem:[#allocation2 + $0x4] sm:$0x3] %vm84_vm0, %v78_v10  ;;  %88 = vst.msk [vmem:[#allocation2 + $0x6] sm:$0x3] %vm84_vm0, %v79_v11 }
   0x7   :  { %v82_v20 = vadd.f32 %v115_v18, %v18_v17  ;;  %v19_v21 = vld [vmem:[%s230_s0 + $0xe] sm:$0x3]  ;;  %v116_v22 = vld [vmem:[%s231_s1 + $0x7] ss:$0 sm:$0xff] }
   0x8   :  { %7 = vsyncpa [#allocation3], 0  ;;  %89 = vst.msk [vmem:[#allocation2 + $0x8] sm:$0x3] %vm84_vm0, %v80_v15  ;;  %v83_v23 = vadd.f32 %v116_v22, %v19_v21  ;;  %s144_s13 = smov [#allocation2]  }
   0x9   :  { %s98_s14 = sshll.u32 %s144_s13, 4  ;;  %90 = vst.msk [vmem:[#allocation2 + $0xa] sm:$0x3] %vm84_vm0, %v81_v19  ;;  %91 = vst.msk [vmem:[#allocation2 + $0xc] sm:$0x3] %vm84_vm0, %v82_v20  ;;  %s99_s14 = int_to_ptr.vmem [resolvable:$true] %s98_s14 }
   0xa   :  { %92 = vst.msk [vmem:[#allocation2 + $0xe] sm:$0x3] %vm84_vm0, %v83_v23  ;;  %s120_s15 = scalar_lea.vmem %s99_s14, 256  ;;  %p125_p1 = scmp.lt.s32.totalorder %s99_s14, %s99_s14 }
   0xb   :  { %p121_p0 = scmp.ne.s32.totalorder %s99_s14, %s120_s15  ;;  %p126_p2 = scmp.lt.s32.totalorder %s120_s15, %s120_s15 }
   0xd   :  { %p127_p3 = por %p126_p2, %p125_p1 }
   0xf   :  { %p128_p4 = pnand %p127_p3, %p121_p0 }
  0x11   :  { %131 = shalt.err (!%p128_p4)
}
  0x12   :  { %s132_s16 = scalar_lea.hbm %s232_s2, 256 }
  0x13   :  { %p133_p5 = scmp.ne.s32.totalorder %s232_s2, %s132_s16  ;;  %p136_p6 = scmp.lt.u32.totalorder %s132_s16, %s232_s2 }
  0x15   :  { %p138_p7 = pnand %p136_p6, %p133_p5 }
  0x17   :  { %141 = shalt.err (!%p138_p7)
}
  0x18   :  { %s145_s21 = smov 32   ;;  %s146_s22 = smov 2  }
  0x19   :  { %104 = dma.vmem_to_hbm [thread:$0]  %s99_s14, 256, %s232_s2, [#allocation3], %s145_s21, %s145_s21, %s146_s22  }
  0x1a   :  { %142 = dma.done.wait [#allocation3], 256  }
  0x1b   :  { %143 = vsyncadd [#allocation3], 4294967040 }
  0x1c   :  { %108 = vsyncpa [#allocation3], 1 }

</bundles_post_ra>
